<compile_context>
chip_gen: v6e
topology: v6e:2x2x1
jax: 0.10.0
libtpu: 0.0.40
codegen_flags: <defaults>
</compile_context>

<pallas_src>
import functools

import jax
import jax.numpy as jnp
from jax.experimental import pallas as pl
from jax.experimental.pallas import tpu as pltpu

EPS = 1e-5  # PyTorch BatchNorm2d default


# ---------------------------------------------------------------------------
# Kernels
# ---------------------------------------------------------------------------
def conv_stats_kernel(p_ref, w_ref, conv_ref, stats_ref, *, ts):
    # p_ref:     (1, K, TS)        bf16  patches^T tile (pixels on lanes)
    # w_ref:     (Cout, K)         bf16  whole weight, resident across the grid
    # conv_ref:  (1, Cout, TS)     bf16  conv tile written back to HBM
    # stats_ref: (1, 1, 2*Cout, 128) f32 [sum ; sum-of-squares] lane-folded partials
    conv = jnp.dot(w_ref[...], p_ref[0], preferred_element_type=jnp.float32)
    conv_ref[...] = conv[None].astype(conv_ref.dtype)

    # Fold lanes in 128-wide, lane-tile-aligned groups: pure VPU adds in the hot pass;
    # the tiny (N, S_tiles, 2*Cout, 128) reduction happens outside the kernel.
    psum = conv[:, 0:128]
    psumsq = psum * psum
    for j in range(1, ts // 128):
        blk = conv[:, j * 128:(j + 1) * 128]
        psum = psum + blk
        psumsq = psumsq + blk * blk
    stats_ref[...] = jnp.concatenate([psum, psumsq], axis=0)[None, None]


def bn_relu_kernel(conv_ref, scale_ref, shift_ref, out_ref):
    # conv_ref: (1, Cout, TS2) bf16; scale/shift: (Cout, 1) f32 hoisted BN affine.
    y = conv_ref[...].astype(jnp.float32) * scale_ref[...] + shift_ref[...]
    out_ref[...] = jnp.maximum(y, 0.0)


# ---------------------------------------------------------------------------
# Host-side plumbing
# ---------------------------------------------------------------------------
def _round_up(a, b):
    return (a + b - 1) // b * b


def _vmem_capacity_bytes():
    try:
        return int(pltpu.get_tpu_info().vmem_capacity_bytes)
    except Exception:
        return 64 * 1024 * 1024  # conservative fallback (v7x per-core VMEM)


def _largest_spatial_tile(sp, per_col_bytes, fixed_bytes, budget, cap=None):
    # Largest multiple of 128 that divides sp (already a 128-multiple), fits the VMEM
    # budget, and respects the optional cap.
    n_lt = sp // 128
    for d in range(n_lt, 0, -1):
        if n_lt % d:
            continue
        t = d * 128
        if cap is not None and t > cap:
            continue
        if fixed_bytes + t * per_col_bytes <= budget:
            return t
    return 128


def conv_block_forward(x, conv_w, conv_b, bn_gamma, bn_beta, padding,
                       spatial_tile=None, compute_dtype=jnp.bfloat16):
    """Conv2d(stride 1) -> BatchNorm2d(batch stats) -> ReLU. NCHW in, NCHW out."""
    # conv_b intentionally unused: under train-mode BN the per-channel bias is removed
    # exactly by the batch-mean subtraction (NOT valid for eval-mode BN).
    del conv_b
    n, cin, h, w = x.shape
    cout, _, kh, kw = conv_w.shape
    oh = h + 2 * padding - kh + 1
    ow = w + 2 * padding - kw + 1
    ohw = oh * ow
    k = cin * kh * kw
    sp = _round_up(ohw, 128)  # only the pixel (lane) axis gets padded

    # ---- im2col^T, channel-major (N, K, Sp), one fused XLA chain, bf16 ------------
    # NCHW is already (channels, pixels)-major, so no transpose is needed and the
    # result reshapes straight into the layout pass 1 consumes.
    # TODO(synk): replace with fully-implicit im2col (shifted matmuls + halo DMA).
    xc = jnp.pad(x.astype(compute_dtype),
                 ((0, 0), (0, 0), (padding, padding), (padding, padding)))
    cols = [xc[:, :, i:i + oh, j:j + ow] for i in range(kh) for j in range(kw)]
    patches_t = jnp.stack(cols, axis=2).reshape(n, k, ohw)  # k-order = (cin, kh, kw)
    if sp != ohw:
        patches_t = jnp.pad(patches_t, ((0, 0), (0, 0), (0, sp - ohw)))

    w_mat = conv_w.reshape(cout, k).astype(compute_dtype)    # same (cin, kh, kw) order
    gamma = bn_gamma.astype(jnp.float32)
    beta = bn_beta.astype(jnp.float32)

    # ---- Generation-aware VMEM budget / tile choice --------------------------------
    cap = _vmem_capacity_bytes()                      # 128 MiB v5e/v6e, 64 MiB v7x
    budget = max(8 << 20, min(24 << 20, cap // 3))    # per-pass working-set target
    vmem_limit = int(min(cap // 2, 32 << 20))         # explicit scoped-VMEM limit
    isz = jnp.dtype(compute_dtype).itemsize

    # Pass 1 per-pixel bytes: double-buffered patches + conv tiles + f32 conv value.
    p1_col = 2 * k * isz + 2 * cout * isz + cout * 4
    p1_fix = 2 * cout * k * isz + 2 * (2 * cout * 128) * 4
    ts1 = _largest_spatial_tile(sp, p1_col, p1_fix, budget, cap=spatial_tile)
    # Pass 2 is pure HBM streaming -> its own, typically larger tile.
    p2_col = 2 * cout * isz + 2 * cout * 4
    ts2 = _largest_spatial_tile(sp, p2_col, 0, budget)

    # ---- Pass 1: conv matmul + per-tile partial BN statistics ----------------------
    conv_i, stats = pl.pallas_call(
        functools.partial(conv_stats_kernel, ts=ts1),
        out_shape=(
            jax.ShapeDtypeStruct((n, cout, sp), compute_dtype),      # bf16 intermediate
            jax.ShapeDtypeStruct((n, sp // ts1, 2 * cout, 128), jnp.float32),
        ),
        grid=(n, sp // ts1),
        in_specs=[
            pl.BlockSpec((1, k, ts1), lambda i, s: (i, 0, s)),
            pl.BlockSpec((cout, k), lambda i, s: (0, 0)),            # resident weight
        ],
        out_specs=(
            pl.BlockSpec((1, cout, ts1), lambda i, s: (i, 0, s)),
            pl.BlockSpec((1, 1, 2 * cout, 128), lambda i, s: (i, s, 0, 0)),
        ),
        compiler_params=pltpu.CompilerParams(
            dimension_semantics=("parallel", "parallel"),
            vmem_limit_bytes=vmem_limit),
    )(patches_t, w_mat)

    # ---- BN finalize (tiny, plain JAX, f32) -----------------------------------------
    # Zero spatial-padding columns contribute exactly 0 to both accumulators (bias
    # dropped), so divide by the true element count.
    count = n * ohw
    ch = jnp.sum(stats, axis=(0, 1, 3))                       # (2*Cout,)
    mean = ch[:cout] / count
    var = jnp.maximum(ch[cout:] / count - mean * mean, 0.0)   # biased var, clamped
    inv_std = jax.lax.rsqrt(var + EPS)
    scale = (gamma * inv_std).reshape(cout, 1)                 # y = conv*scale + shift
    shift = (beta - mean * gamma * inv_std).reshape(cout, 1)

    # ---- Pass 2: fused scale/shift + ReLU, writes NCHW directly ---------------------
    out_flat = pl.pallas_call(
        bn_relu_kernel,
        out_shape=jax.ShapeDtypeStruct((n, cout, sp), jnp.float32),
        grid=(n, sp // ts2),
        in_specs=[
            pl.BlockSpec((1, cout, ts2), lambda i, s: (i, 0, s)),
            pl.BlockSpec((cout, 1), lambda i, s: (0, 0)),
            pl.BlockSpec((cout, 1), lambda i, s: (0, 0)),
        ],
        out_specs=pl.BlockSpec((1, cout, ts2), lambda i, s: (i, 0, s)),
        compiler_params=pltpu.CompilerParams(
            dimension_semantics=("parallel", "parallel"),
            vmem_limit_bytes=vmem_limit),
    )(conv_i, scale, shift)

    if sp != ohw:
        out_flat = out_flat[:, :, :ohw]
    return out_flat.reshape(n, cout, oh, ow)   # already NCHW: no host-side transpose


def conv_block_reference(x, conv_w, conv_b, bn_gamma, bn_beta, padding):
    # Pure-JAX f32 reference replicating torch semantics (training-mode BN).
    y = jax.lax.conv_general_dilated(
        x.astype(jnp.float32), conv_w.astype(jnp.float32),
        window_strides=(1, 1),
        padding=[(padding, padding), (padding, padding)],
        dimension_numbers=("NCHW", "OIHW", "NCHW"),
    ) + conv_b[None, :, None, None]
    mean = y.mean(axis=(0, 2, 3), keepdims=True)
    var = ((y - mean) ** 2).mean(axis=(0, 2, 3), keepdims=True)  # biased
    yn = (y - mean) / jnp.sqrt(var + EPS)
    yn = yn * bn_gamma[None, :, None, None] + bn_beta[None, :, None, None]
    return jnp.maximum(yn, 0.0)


if __name__ == "__main__":
    # Small deterministic problem: N=2, Cin=4, H=W=16, Cout=8, kernel=3, padding=1.
    N, CIN, H, W = 2, 4, 16, 16
    COUT, K, PAD = 8, 3, 1

    key = jax.random.PRNGKey(0)
    kx, kwk, kb = jax.random.split(key, 3)
    x = jax.random.normal(kx, (N, CIN, H, W), dtype=jnp.float32)
    conv_w = jax.random.normal(kwk, (COUT, CIN, K, K), dtype=jnp.float32) * 0.1
    conv_b = jax.random.normal(kb, (COUT,), dtype=jnp.float32) * 0.1
    bn_gamma = jnp.ones((COUT,), dtype=jnp.float32)   # PyTorch BatchNorm2d default init
    bn_beta = jnp.zeros((COUT,), dtype=jnp.float32)

    # spatial_tile=128 forces a (2, 2) pass-1 grid (OH*OW = 256) so the multi-tile
    # partial-stats path is exercised; pass 2 independently picks its own larger tile.
    out = conv_block_forward(x, conv_w, conv_b, bn_gamma, bn_beta, PAD,
                             spatial_tile=128)
    out = jax.block_until_ready(out)

    ref = conv_block_reference(x, conv_w, conv_b, bn_gamma, bn_beta, PAD)
    assert out.shape == (N, COUT, H, W)
    # bf16 MXU inputs + bf16 conv intermediate => ~1e-2-level deviation vs the f32
    # reference (statistics and BN finalize stay in f32), per the perf review.
    max_err = float(jnp.max(jnp.abs(out - ref)))
    assert jnp.allclose(out, ref, atol=5e-2, rtol=5e-2), max_err

    print("KERNEL_OK")
</pallas_src>

<mosaic_0001>
module attributes {stable_mosaic.version = 11 : i64} {
  func.func @conv_stats_kernel(%arg0: i32, %arg1: i32, %arg2: memref<1x36x128xbf16, #tpu.memory_space<vmem>>, %arg3: memref<8x36xbf16, #tpu.memory_space<vmem>>, %arg4: memref<1x8x128xbf16, #tpu.memory_space<vmem>>, %arg5: memref<1x1x16x128xf32, #tpu.memory_space<vmem>>) attributes {dimension_semantics = [#tpu.dimension_semantics<parallel>, #tpu.dimension_semantics<parallel>], iteration_bounds = array<i64: 2, 2>, scalar_prefetch = 0 : i64, scratch_operands = 0 : i64, tpu.core_type = #tpu.core_type<tc>, window_params = [{transform_indices = @transform_0, window_bounds = array<i64: 1, 36, 128>}, {pipeline_mode = #tpu.pipeline_mode<synchronous>, transform_indices = @transform_1, window_bounds = array<i64: 8, 36>}, {transform_indices = @transform_2, window_bounds = array<i64: 1, 8, 128>}, {transform_indices = @transform_3, window_bounds = array<i64: 1, 1, 16, 128>}]} {
    %c0 = arith.constant 0 : index
    %c0_0 = arith.constant 0 : index
    %0 = vector.load %arg3[%c0, %c0_0] : memref<8x36xbf16, #tpu.memory_space<vmem>>, vector<8x36xbf16>
    %c0_1 = arith.constant 0 : index
    %c0_2 = arith.constant 0 : index
    %c0_3 = arith.constant 0 : index
    %1 = vector.load %arg2[%c0_1, %c0_2, %c0_3] : memref<1x36x128xbf16, #tpu.memory_space<vmem>>, vector<1x36x128xbf16>
    %2 = vector.shape_cast %1 : vector<1x36x128xbf16> to vector<36x128xbf16>
    %cst = arith.constant dense<0.000000e+00> : vector<8x128xf32>
    %3 = tpu.matmul %0, %2, %cst {dimension_numbers = #tpu.dot_dimension_numbers<[1], [0], [0], [1], [0, 0, 1, 1], [], []>} : vector<8x36xbf16>, vector<36x128xbf16>, vector<8x128xf32> -> vector<8x128xf32>
    %4 = vector.shape_cast %3 : vector<8x128xf32> to vector<1x8x128xf32>
    %5 = arith.truncf %4 : vector<1x8x128xf32> to vector<1x8x128xbf16>
    %c0_4 = arith.constant 0 : index
    %c0_5 = arith.constant 0 : index
    %c0_6 = arith.constant 0 : index
    %6 = vector.load %arg4[%c0_4, %c0_5, %c0_6] : memref<1x8x128xbf16, #tpu.memory_space<vmem>>, vector<1x8x128xbf16>
    tpu.vector_store %arg4[%c0_4, %c0_5, %c0_6], %5 {strides = array<i32>} : memref<1x8x128xbf16, #tpu.memory_space<vmem>>, vector<1x8x128xbf16>,
    %7 = arith.mulf %3, %3 : vector<8x128xf32>
    %8 = tpu.concatenate %3, %7 in 0 : vector<8x128xf32>, vector<8x128xf32> -> vector<16x128xf32>
    %9 = vector.shape_cast %8 : vector<16x128xf32> to vector<1x1x16x128xf32>
    %c0_7 = arith.constant 0 : index
    %c0_8 = arith.constant 0 : index
    %c0_9 = arith.constant 0 : index
    %c0_10 = arith.constant 0 : index
    %10 = vector.load %arg5[%c0_7, %c0_8, %c0_9, %c0_10] : memref<1x1x16x128xf32, #tpu.memory_space<vmem>>, vector<1x1x16x128xf32>
    tpu.vector_store %arg5[%c0_7, %c0_8, %c0_9, %c0_10], %9 {strides = array<i32>} : memref<1x1x16x128xf32, #tpu.memory_space<vmem>>, vector<1x1x16x128xf32>,
    return
  }
  func.func @transform_0(%arg0: i32, %arg1: i32) -> (i32, i32, i32) {
    %c0_i32 = arith.constant 0 : i32
    %c0_i32_0 = arith.constant 0 : i32
    return %arg0, %c0_i32, %arg1 : i32, i32, i32
  }
  func.func @transform_1(%arg0: i32, %arg1: i32) -> (i32, i32) {
    %c0_i32 = arith.constant 0 : i32
    %c0_i32_0 = arith.constant 0 : i32
    %c0_i32_1 = arith.constant 0 : i32
    return %c0_i32, %c0_i32_0 : i32, i32
  }
  func.func @transform_2(%arg0: i32, %arg1: i32) -> (i32, i32, i32) {
    %c0_i32 = arith.constant 0 : i32
    %c0_i32_0 = arith.constant 0 : i32
    return %arg0, %c0_i32, %arg1 : i32, i32, i32
  }
  func.func @transform_3(%arg0: i32, %arg1: i32) -> (i32, i32, i32, i32) {
    %c0_i32 = arith.constant 0 : i32
    %c0_i32_0 = arith.constant 0 : i32
    %c0_i32_1 = arith.constant 0 : i32
    return %arg0, %arg1, %c0_i32, %c0_i32_0 : i32, i32, i32, i32
  }
}

</mosaic_0001>

<bundles_post_ra>
// kernel: tpu_custom_call.1
= control target key start
LH: loop header
LB: loop body
LE: loop exit
PB: predicated region body
PF: predicated region fallthrough
CT: control target
= control target key end

     0   :  { %s943_s0 = inlined_call_operand.vmem [shape: bf16[2,36,256], index: 0, kind: input, shape index: {}]   ;;  %s944_s1 = inlined_call_operand.vmem [shape: bf16[8,36], index: 1, kind: input, shape index: {}]   ;;  %s945_s2 = inlined_call_operand.hbm [shape: bf16[2,8,256], index: 2, kind: output, shape index: {0}]   ;;  %s946_s3 = inlined_call_operand.hbm [shape: f32[2,2,16,128], index: 3, kind: output, shape index: {1}]  }
   0x1   :  { %948 = sst [smem:[#allocation10_spill]] %s943_s0 }
   0x2   :  { %949 = sst [smem:[#allocation11_spill]] %s944_s1 }
   0x3   :  { %9 = vsyncpa [#allocation4], 0 }
   0x4   :  { %11 = vsyncpa [#allocation4 + $0x1], 0 }
   0x5   :  { %12 = vsyncpa [#allocation6], 0 }
   0x6   :  { %14 = vsyncpa [#allocation6 + $0x1], 0  ;;  %s759_s12 = smov 0   ;;  %s761_s13 = smov 0  }
   0x7   :  { %s763_s14 = smov 0   ;;  %s765_s15 = smov 0  }
   0x8   :  { %s767_s16 = smov 0   ;;  %s769_s17 = smov 0  }
   0x9   :  { %s771_s18 = smov 0   ;;  %s773_s19 = smov 0  }
   0xa LB: > { %s488_s20 = sadd.s32 4294967295, %s731_s19   ;;  %s489_s21 = sadd.s32 4294967294, %s731_s19   ;;  %s731_s19 = sphi %s773_s19, %s20_s19   ;;  %s727_s18 = sphi %s771_s18, %s963_s18   ;;  %s723_s17 = sphi %s769_s17, %s962_s17   ;;  %s719_s16 = sphi %s767_s16, %s961_s16   ;;  %s715_s15 = sphi %s765_s15, %s960_s15   ;;  %s711_s14 = sphi %s763_s14, %s959_s14   ;;  %s707_s13 = sphi %s761_s13, %s958_s13   ;;  %s703_s12 = sphi %s759_s12, %s957_s12  }
   0xb   : > { %s29_s22 = sadd.s32 1, %s723_s17  ;;  %s32_s23 = sadd.s32 1, %s727_s18 }
   0xc   : > { %p30_p0 = scmp.ge.s32.totalorder %s29_s22, 2  ;;  %p48_p1 = scmp.ne.s32.totalorder %s711_s14, %s707_s13 }
   0xd   : > { %p49_p2 = scmp.eq.s32.totalorder %s731_s19, 0  ;;  %p101_p5 = scmp.eq.s32.totalorder %s488_s20, 3 }
   0xe   : > { %s965_s22 = smov (%p30_p0, %s29_s22), 0  ;;  %s967_s23 = smov (!%p30_p0, %s32_s23), %s727_s18 }
   0xf   : > { %s37_s24 = ssub.s32 %s723_s17, %s965_s22  ;;  %p811_p3 = por %p49_p2, %p48_p1 }
  0x10   : > { %p34_p4 = scmp.ge.s32.totalorder %s967_s23, 2  ;;  %p106_p6 = scmp.ne.s32.totalorder %s707_s13, %s703_s12 }
  0x11   : > { %p107_p7 = scmp.eq.s32.totalorder %s489_s21, 3  ;;  %p819_p8 = por %p101_p5, %p48_p1 }
  0x12   : > { %s969_s23 = smov (%p34_p4, %s967_s23), 0  ;;  %s41_s30 = sadd.s32 1, %s711_s14 }
  0x13   : > { %951 = sst [smem:[#allocation9_spill]] %s969_s23  ;;  %p823_p9 = por %p107_p7, %p106_p6 }
  0x14   : > { %s36_s28 = ssub.s32 %s727_s18, %s969_s23  ;;  %p491_p11 = scmp.ge.s32.totalorder %s731_s19, 4 }
  0x15   : > { %s38_s29 = sor.u32 %s37_s24, %s36_s28 }
  0x16   : > { %p39_p10 = scmp.eq.s32.totalorder %s38_s29, 0  ;;  %154 = sbr.rel (%p491_p11) target bundleno = 39 (0x27), region = 20 }
  0x18   : > { %s831_s4 = scalar_select %p39_p10, %s711_s14, %s41_s30  }
  0x1b   : > { %157 = sbr.rel (!%p811_p3) target bundleno = 39 (0x27), region = 24  ;;  %s159_s5 = sand.u32 (%p811_p3), 1, %s711_s14  }
  0x1c   : > { %s524_s6 = smul.u32 (%p811_p3), 10, %s727_s18  ;;  %s954_s0 = sld [smem:[#allocation10_spill]] (%p811_p3) }
  0x1d   : > { %s523_s7 = smul.u32 (%p811_p3), 20, %s159_s5 }
  0x1e   : > { %s163_s8 = sadd.s32 (%p811_p3), %s723_s17, %s524_s6 }
  0x1f   : > { %s492_s9 = sshll.u32 (%p811_p3), %s163_s8, 2  ;;  %s161_s21 = scalar_lea.vmem (%p811_p3), [#allocation2], %s523_s7 }
  0x22   : > { %s165_s20 = scalar_lea.vmem %s954_s0, %s492_s9 }
  0x23   : > { %v182_v0 = vld [vmem:[%s165_s20] sm:$0xf]  ;;  %v184_v1 = vld [vmem:[%s165_s20 + $0x8] sm:$0xf]  ;;  %v186_v2 = vld [vmem:[%s165_s20 + $0x10] sm:$0xf] }
  0x24   : > { %183 = vst [vmem:[%s161_s21] sm:$0xf] %v182_v0  ;;  %185 = vst [vmem:[%s161_s21 + $0x4] sm:$0xf] %v184_v1  ;;  %v188_v3 = vld [vmem:[%s165_s20 + $0x18] sm:$0xf] }
  0x25   : > { %187 = vst [vmem:[%s161_s21 + $0x8] sm:$0xf] %v186_v2  ;;  %v190_v4 = vld [vmem:[%s165_s20 + $0x20] sm:$0xf]  ;;  %189 = vst [vmem:[%s161_s21 + $0xc] sm:$0xf] %v188_v3 }
  0x26   : > { %191 = vst [vmem:[%s161_s21 + $0x10] sm:$0xf] %v190_v4 }
  0x27 PF: > { %p493_p12 = scmp.ge.s32.totalorder %s731_s19, 1  ;;  %p224_p13 = scmp.lt.s32.totalorder %s731_s19, 5 }
  0x29   : > { %p225_p0 = pnand %p493_p12, %p224_p13 }
  0x2a   : > { %s845_s24 = sand.u32 (!%p225_p0), 1, %s707_s13   ;;  %s955_s1 = sld [smem:[#allocation11_spill]] (!%p225_p0) }
  0x2b   : > { %228 = sbr.rel (%p225_p0) target bundleno = 293 (0x125), region = 65  ;;  %s495_s5 = sshll.u32 (!%p225_p0), %s845_s24, 4 }
  0x2c   : > { %s525_s25 = smul.u32 (!%p225_p0), 20, %s845_s24  ;;  %s502_s6 = sshll.u32 (!%p225_p0), %s719_s16, 1 }
  0x2d   : > { %s494_s7 = sshll.u32 (!%p225_p0), %s845_s24, 2  ;;  %s504_s8 = sshll.u32 (!%p225_p0), %s715_s15, 1 }
  0x2e   : > { %s233_s28 = scalar_lea.vmem (!%p225_p0), [#allocation2], %s525_s25  ;;  %s505_s9 = sshll.u32 (!%p225_p0), %s719_s16, 2 }
  0x2f   : > { %s351_s10 = sadd.s32 (!%p225_p0), %s715_s15, %s502_s6  ;;  %s258_s11 = scalar_lea.vmem (!%p225_p0), [#allocation5], %s495_s5 }
  0x30   : > { %v733_v5 = vmov 0.0   ;;  %vm734_vm0 = vmmov 0   ;;  %vm285_vm1 = vcmask 1041408   ;;  %v606_v6 = vld [vmem:[%s233_s28 + $0x10] ss:$0 sps:$4 sm:$0x33]   ;;  %s367_s21 = sadd.s32 %s505_s9, %s504_s8 }
  0x31   : > { %513 = vmatprep.subr.bf16.mxu0 %v733_v5  ;;  %519 = vmatprep.mubr.msk.bf16.mxu0 %vm734_vm0, %v733_v5  ;;  %v287_v7 = vsel %vm285_vm1, %v606_v6, 0  ;;  %v607_v8 = vld [vmem:[%s233_s28 + $0x8] sm:$0xff]   ;;  %v608_v9 = vld [vmem:[%s233_s28] sm:$0xff]   ;;  %vm281_vm2 = vcmask 293888   ;;  %s370_s20 = sshll.u32 %s258_s11, 4  ;;  %s503_s25 = sshll.u32 %s351_s10, 6  ;;  %s857_s20 = int_to_ptr.vmem [resolvable:$true] %s370_s20 }
  0x32   : > { %514 = vmatpush3.bf16.msra.mxu0 %v287_v7  ;;  %v260_v10 = vld [vmem:[%s955_s1] sm:$0xf]  ;;  %s251_s28 = scalar_lea.vmem [#allocation3], %s494_s7  ;;  %s506_s29 = sshll.u32 %s367_s21, 7 }
  0x33   : > { %515 = vmatprep.subr.bf16.mxu0 %v733_v5  ;;  %s355_s0 = sshll.u32 %s251_s28, 4  ;;  %s862_s23 = scalar_lea.hbm %s945_s2, %s503_s25  ;;  %s864_s0 = int_to_ptr.vmem [resolvable:$true] %s355_s0 }
  0x34   : > { %s869_s5 = scalar_lea.hbm %s946_s3, %s506_s29  ;;  %s335_s1 = scalar_lea.sflag [#allocation4], %s845_s24 }
  0x35   : > { %s609_s6 = scalar_lea.vmem %s864_s0, 64  ;;  %s735_s7 = smov [#allocation3]  }
  0x36   : > { %516 = vmatpush3.bf16.msra.mxu0 %v607_v8  ;;  %p610_p1 = scmp.ne.s32.totalorder %s864_s0, %s609_s6  ;;  %s613_s8 = sshll.u32 %s735_s7, 4  ;;  %s614_s8 = int_to_ptr.vmem [resolvable:$false] %s613_s8 }
  0x37   : > { %517 = vmatprep.subr.bf16.mxu0 %v733_v5  ;;  %s615_s9 = scalar_lea.vmem %s614_s8, 128  ;;  %p616_p4 = scmp.lt.s32.totalorder %s864_s0, %s614_s8 }
  0x38   : > { %p611_p2 = pnand %p610_p1, %p819_p8  ;;  %p617_p5 = scmp.lt.s32.totalorder %s615_s9, %s609_s6 }
  0x3a   : > { %518 = vmatpush3.bf16.msra.mxu0 %v608_v9  ;;  %p612_p3 = pneg %p611_p2  ;;  %p618_p6 = por %p617_p5, %p616_p4 }
  0x3c   : > { %p619_p7 = pnand %p618_p6, %p612_p3 }
  0x3d   : > { %520 = vmatmul.mubr.msk.bf16.vlgmr.msra.gmra.mxu0 %vm281_vm2, %v260_v10 }
  0xfd   : > { %v323_v11 = vpop.f32.mrf.mxu0 }
  0xfe   : > { %v329_v12 = vpack.c.bf16 %v323_v11, %v323_v11  ;;  %v331_v13 = vmul.f32 %v323_v11, %v323_v11  ;;  %332 = vst [vmem:[%s258_s11] sm:$0xff] %v323_v11 }
  0xff   : > { %v521_v14 = vpop.f32.mrf.mxu0 }
 0x100   : > { %333 = vst [vmem:[%s258_s11 + $0x8] sm:$0xff] %v331_v13  ;;  %330 = vst [vmem:[%s251_s28] sm:$0xf] %v329_v12 }
 0x101   : > { %v326_v15 = vpop.f32.mrf.mxu0 }
 0x102   : > { %622 = shalt.err (!%p619_p7)
}
 0x103   : > { %s623_s10 = scalar_lea.hbm %s862_s23, 64  ;;  %s627_s25 = scalar_lea.hbm %s945_s2, 256 }
 0x104   : > { %p624_p10 = scmp.ne.s32.totalorder %s862_s23, %s623_s10  ;;  %p628_p13 = scmp.lt.s32.totalorder %s862_s23, %s945_s2 }
 0x105   : > { %p629_p0 = scmp.lt.s32.totalorder %s627_s25, %s623_s10 }
 0x106   : > { %p625_p11 = pnand %p624_p10, %p819_p8 }
 0x107   : > { %p630_p1 = por %p629_p0, %p628_p13 }
 0x108   : > { %p626_p12 = pneg %p625_p11 }
 0x10a   : > { %p631_p2 = pnand %p630_p1, %p626_p12 }
 0x10c   : > { %634 = shalt.err (!%p631_p2)
}
 0x10d   : > { %526 = dma.vmem_to_hbm [thread:$0]  (%p819_p8), %s864_s0, 64, %s862_s23, %s335_s1  }
 0x10e   : > { %s340_s30 = scalar_lea.sflag [#allocation6], %s845_s24  ;;  %s635_s15 = scalar_lea.vmem %s857_s20, 256 }
 0x10f   : > { %p636_p3 = scmp.ne.s32.totalorder %s857_s20, %s635_s15  ;;  %s736_s16 = smov [#allocation5]  }
 0x110   : > { %s639_s6 = sshll.u32 %s736_s16, 4  ;;  %s640_s6 = int_to_ptr.vmem [resolvable:$false] %s639_s6 }
 0x111   : > { %p637_p4 = pnand %p636_p3, %p819_p8  ;;  %s641_s7 = scalar_lea.vmem %s640_s6, 512 }
 0x112   : > { %p642_p6 = scmp.lt.s32.totalorder %s857_s20, %s640_s6  ;;  %p643_p7 = scmp.lt.s32.totalorder %s641_s7, %s635_s15 }
 0x113   : > { %p638_p5 = pneg %p637_p4 }
 0x114   : > { %p644_p10 = por %p643_p7, %p642_p6 }
 0x116   : > { %p645_p11 = pnand %p644_p10, %p638_p5 }
 0x118   : > { %648 = shalt.err (!%p645_p11)
}
 0x119   : > { %s649_s0 = scalar_lea.hbm %s869_s5, 256  ;;  %s653_s8 = scalar_lea.hbm %s946_s3, 1024 }
 0x11a   : > { %p650_p12 = scmp.ne.s32.totalorder %s869_s5, %s649_s0  ;;  %p654_p1 = scmp.lt.s32.totalorder %s869_s5, %s946_s3 }
 0x11b   : > { %p655_p2 = scmp.lt.s32.totalorder %s653_s8, %s649_s0 }
 0x11c   : > { %p651_p13 = pnand %p650_p12, %p819_p8 }
 0x11d   : > { %p656_p3 = por %p655_p2, %p654_p1 }
 0x11e   : > { %p652_p0 = pneg %p651_p13 }
 0x120   : > { %p657_p4 = pnand %p656_p3, %p652_p0 }
 0x122   : > { %660 = shalt.err (!%p657_p4)
}
 0x123   : > { %s737_s11 = smov 128   ;;  %s738_s21 = smov 8   ;;  %v522_v16 = vpop.f32.mrf.mxu0 }
 0x124   : > { %527 = dma.vmem_to_hbm [thread:$0]  (%p819_p8), %s857_s20, 256, %s869_s5, %s340_s30, %s737_s11, %s737_s11, %s738_s21  }
 0x125 PF: > { %p537_p5 = scmp.ge.s32.totalorder %s731_s19, 2  ;;  %s385_s25 = sand.u32 1, %s703_s12  }
 0x126   : > { %s386_s28 = scalar_lea.sflag [#allocation4], %s385_s25 }
 0x127   : > { %p531_p6 = pnand %p537_p5, %p823_p9 }
 0x129   : > { %p532_p7 = pneg %p531_p6 }
 0x12b   : > { %694 = dma.done.wait (%p532_p7), %s386_s28, 64  }
 0x12c   : > { %696 = vsyncadd (%p532_p7), %s386_s28, 4294967232  ;;  %s395_s29 = scalar_lea.sflag [#allocation6], %s385_s25 }
 0x12d   : > { %698 = dma.done.wait (%p532_p7), %s395_s29, 256  }
 0x12e   : > { %700 = vsyncadd (%p532_p7), %s395_s29, 4294967040  ;;  %s20_s19 = sadd.s32 1, %s731_s19   ;;  %s956_s26 = sld [smem:[#allocation9_spill]] }
 0x12f   : > { %p17_p10 = scmp.ge.s32.totalorder %s20_s19, 6   ;;  %s957_s12 = smov %s707_s13 }
 0x130   : > { %s958_s13 = smov %s711_s14  ;;  %s959_s14 = smov %s831_s4 }
 0x131   : > { %s960_s15 = smov %s723_s17  ;;  %s961_s16 = smov %s727_s18 }
 0x132   : > { %s962_s17 = smov %s965_s22  ;;  %19 = sbr.rel (!%p17_p10) target bundleno = 10 (0xa), region = 126 }
 0x134   : > { %s963_s18 = smov %s956_s26 }
 0x137   :  { %400 = vsyncpa [#allocation4], 1 }
 0x138   :  { %402 = vsyncpa [#allocation4 + $0x1], 1 }
 0x139   :  { %403 = vsyncpa [#allocation6], 1 }
 0x13a   :  { %405 = vsyncpa [#allocation6 + $0x1], 1 }

</bundles_post_ra>
